<compile_context>
chip_gen: v7x
topology: tpu7x:2x2x1
jax: 0.10.0
libtpu: 0.0.40
codegen_flags: <defaults>
</compile_context>

<pallas_src>
import functools
import math

import jax
import jax.numpy as jnp
import numpy as np
from jax.experimental import pallas as pl
from jax.experimental.pallas import tpu as pltpu


# ----------------------------------------------------------------------------
# Kernel 1: generic fused  y = x @ W + b   (projections + BN, upsample + BN)
# ----------------------------------------------------------------------------
def _matmul_bias_kernel(x_ref, w_ref, b_ref, o_ref):
    o_ref[...] = (
        jnp.dot(x_ref[...], w_ref[...], preferred_element_type=jnp.float32)
        + b_ref[...]
    )


def matmul_bias(x, w, b, tm=256):
    """x: (N, K), w: (K, M), b: (1, M) -> (N, M) float32."""
    N, K = x.shape
    M = w.shape[1]
    tm = min(tm, N)
    n_blocks = pl.cdiv(N, tm)
    Np = n_blocks * tm
    if Np != N:
        x = jnp.pad(x, ((0, Np - N), (0, 0)))
    out = pl.pallas_call(
        _matmul_bias_kernel,
        out_shape=jax.ShapeDtypeStruct((Np, M), jnp.float32),
        grid=(n_blocks,),
        in_specs=[
            pl.BlockSpec((tm, K), lambda i: (i, 0)),
            pl.BlockSpec((K, M), lambda i: (0, 0)),
            pl.BlockSpec((1, M), lambda i: (0, 0)),
        ],
        out_specs=pl.BlockSpec((tm, M), lambda i: (i, 0)),
        compiler_params=pltpu.CompilerParams(dimension_semantics=("parallel",)),
    )(x, w, b)
    return out[:N] if Np != N else out


# ----------------------------------------------------------------------------
# Kernel 2: batched per-(batch*channel) attention: softmax(q k^T / sqrt(W)) v
# ----------------------------------------------------------------------------
def _attn_kernel(q_ref, k_ref, v_ref, o_ref, *, inv_scale):
    q = q_ref[...]                                 # (bc, H, W)
    k = k_ref[...]
    v = v_ref[...]
    s = jnp.einsum("chw,cgw->chg", q, k, preferred_element_type=jnp.float32)
    s = s * inv_scale
    m = jnp.max(s, axis=-1, keepdims=True)
    p = jnp.exp(s - m)
    l = jnp.sum(p, axis=-1, keepdims=True)
    o = jnp.einsum("chg,cgw->chw", p, v, preferred_element_type=jnp.float32)
    # NOTE: on hardware `pl.reciprocal(l, approx=True)` routes this to the EUP;
    # plain divide kept here for exact portability (interpret + HW).
    o_ref[...] = o / l


def attention(q, k, v, bc_tile=8):
    """q, k, v: (B*C, H, W) -> (B*C, H, W)."""
    BC, H, W = q.shape
    bt = min(bc_tile, BC)
    n_blocks = pl.cdiv(BC, bt)
    BCp = n_blocks * bt
    if BCp != BC:
        pad = ((0, BCp - BC), (0, 0), (0, 0))
        q, k, v = jnp.pad(q, pad), jnp.pad(k, pad), jnp.pad(v, pad)
    kern = functools.partial(_attn_kernel, inv_scale=1.0 / math.sqrt(float(W)))
    spec = pl.BlockSpec((bt, H, W), lambda i: (i, 0, 0))
    out = pl.pallas_call(
        kern,
        out_shape=jax.ShapeDtypeStruct((BCp, H, W), jnp.float32),
        grid=(n_blocks,),
        in_specs=[spec, spec, spec],
        out_specs=spec,
        compiler_params=pltpu.CompilerParams(dimension_semantics=("parallel",)),
    )(q, k, v)
    return out[:BC] if BCp != BC else out


# ----------------------------------------------------------------------------
# Parameters (deterministic, synthetic)
# ----------------------------------------------------------------------------
def init_params(key, Cq, Ck, Co):
    ks = jax.random.split(key, 26)
    n = lambda i, shape, s=0.3: (s * jax.random.normal(ks[i], shape)).astype(jnp.float32)

    def bn(i):
        return (1.0 + 0.1 * jax.random.normal(ks[i], (Co,)),
                0.1 * jax.random.normal(ks[i + 1], (Co,)),
                0.1 * jax.random.normal(ks[i + 2], (Co,)),
                1.0 + 0.2 * jnp.abs(jax.random.normal(ks[i + 3], (Co,))))

    p = {
        "wq": n(0, (Co, Cq)), "bq": n(1, (Co,), 0.1),
        "wk": n(2, (Co, Ck)), "bk": n(3, (Co,), 0.1),
        "wv": n(4, (Co, Ck)), "bv": n(5, (Co,), 0.1),
        "bn_q": bn(6), "bn_k": bn(10), "bn_v": bn(14),
        "w_out": n(18, (Co, Co, 3, 3)), "b_out": n(19, (Co,), 0.1),   # ConvT: (Cin,Cout,kH,kW)
        "bn_out": bn(20),
        "w_res": n(24, (Cq, Co, 3, 3)), "b_res": n(25, (Co,), 0.1),
    }
    return p


def _fold_bn(bn_params, eps=1e-5):
    g, be, rm, rv = bn_params
    s = g / jnp.sqrt(rv + eps)
    return s.astype(jnp.float32), (be - rm * s).astype(jnp.float32)


# ----------------------------------------------------------------------------
# Forward wrapper
# ----------------------------------------------------------------------------
def cross_attention_forward(query, key_inp, p, *, tm=256, bc_tile=8):
    B, Cq, H, W = query.shape
    Ck = key_inp.shape[1]
    Co = p["wq"].shape[0]
    N = B * H * W

    query_nhwc = jnp.transpose(query, (0, 2, 3, 1))        # (B,H,W,Cq)
    key_nhwc = jnp.transpose(key_inp, (0, 2, 3, 1))        # (B,H,W,Ck)

    # ---- fused q/k/v projections: BN scale folded into weights, one matmul ----
    s_q, t_q = _fold_bn(p["bn_q"])
    s_k, t_k = _fold_bn(p["bn_k"])
    s_v, t_v = _fold_bn(p["bn_v"])
    Wq = p["wq"].T * s_q                                   # (Cq, Co)
    Wk = p["wk"].T * s_k                                   # (Ck, Co)
    Wv = p["wv"].T * s_v                                   # (Ck, Co)
    Zq = jnp.zeros((Cq, Co), jnp.float32)
    Zk = jnp.zeros((Ck, Co), jnp.float32)
    W_proj = jnp.concatenate(
        [jnp.concatenate([Wq, Zq, Zq], axis=1),
         jnp.concatenate([Zk, Wk, Wv], axis=1)], axis=0)   # (Cq+Ck, 3*Co)
    b_proj = jnp.concatenate(
        [p["bq"] * s_q + t_q, p["bk"] * s_k + t_k, p["bv"] * s_v + t_v]
    ).reshape(1, 3 * Co)

    x_in = jnp.concatenate([query_nhwc, key_nhwc], axis=-1).reshape(N, Cq + Ck)
    qkv = matmul_bias(x_in, W_proj, b_proj, tm=tm)         # (N, 3*Co) = [q|k|v]

    # ---- attention over (B*Co) slices of (H, W), bc_tile slices per step ----
    qkv_bc = jnp.transpose(qkv.reshape(B, H, W, 3, Co), (3, 0, 4, 1, 2))
    qkv_bc = qkv_bc.reshape(3, B * Co, H, W)
    attn = attention(qkv_bc[0], qkv_bc[1], qkv_bc[2], bc_tile=bc_tile)
    attn_nhwc = jnp.transpose(attn.reshape(B, Co, H, W), (0, 2, 3, 1))   # (B,H,W,Co)

    # ---- fused ConvT(conv_out)+BN + ConvT(residual): one matmul per tile ----
    # ConvTranspose2d(k=3,s=2,p=1,op=1): out[2m+ph, 2n+pw] is an exact sum of
    # channel matmuls of shifted inputs with single 3x3 taps (sub-pixel decomp).
    s_o, t_o = _fold_bn(p["bn_out"])
    w_out_f = p["w_out"] * s_o[None, :, None, None]        # BN scale folded (Co,Co,3,3)
    w_res = p["w_res"]                                     # (Cq,Co,3,3)
    Cc = Co + Cq

    def tap(kh, kw):                                       # (Cc, Co) = [conv_out ; residual]
        return jnp.concatenate([w_out_f[:, :, kh, kw], w_res[:, :, kh, kw]], axis=0)

    Z = jnp.zeros((Cc, Co), jnp.float32)
    # rows ordered as [x0 | x+W | x+H | x+HW] slabs of Cc channels each
    W_up = jnp.concatenate([
        jnp.concatenate([tap(1, 1), Z, Z, Z], axis=0),                         # parity (0,0)
        jnp.concatenate([tap(1, 2), tap(1, 0), Z, Z], axis=0),                 # parity (0,1)
        jnp.concatenate([tap(2, 1), Z, tap(0, 1), Z], axis=0),                 # parity (1,0)
        jnp.concatenate([tap(2, 2), tap(2, 0), tap(0, 2), tap(0, 0)], axis=0)  # parity (1,1)
    ], axis=1)                                             # (4*Cc, 4*Co)
    b_up = jnp.tile((p["b_out"] * s_o + t_o + p["b_res"]).reshape(1, Co), (1, 4))

    # shifted views concatenated along lanes (one lane-dense read per tile)
    # TODO(synk): a halo-block in-kernel read would avoid the 4x duplication.
    xc = jnp.concatenate([attn_nhwc, query_nhwc], axis=-1)                 # (B,H,W,Cc)
    xW = jnp.pad(xc[:, :, 1:, :], ((0, 0), (0, 0), (0, 1), (0, 0)))
    xH = jnp.pad(xc[:, 1:, :, :], ((0, 0), (0, 1), (0, 0), (0, 0)))
    xHW = jnp.pad(xc[:, 1:, 1:, :], ((0, 0), (0, 1), (0, 1), (0, 0)))
    x_sh = jnp.concatenate([xc, xW, xH, xHW], axis=-1).reshape(N, 4 * Cc)  # (N, 4*Cc)

    planes = matmul_bias(x_sh, W_up, b_up, tm=tm)          # (N, 4*Co) = [p00|p01|p10|p11]

    # interleave parity planes -> (B, Co, 2H, 2W)
    out = planes.reshape(B, H, W, 2, 2, Co)
    out = jnp.transpose(out, (0, 5, 1, 3, 2, 4)).reshape(B, Co, 2 * H, 2 * W)
    return out


# ----------------------------------------------------------------------------
# Pure-JAX reference (eval-mode forward) for cross-checking
# ----------------------------------------------------------------------------
def reference_forward(query, key_inp, p, eps=1e-5):
    def bn(z, prm):
        g, be, rm, rv = prm
        inv = 1.0 / jnp.sqrt(rv + eps)
        return (z - rm[None, :, None, None]) * (g * inv)[None, :, None, None] + be[None, :, None, None]

    def conv1x1(x, w, b):
        return jnp.einsum("bchw,oc->bohw", x, w) + b[None, :, None, None]

    def convT(x, w, b):  # w: (Cin, Cout, 3, 3); stride 2, pad 1, output_padding 1
        w_lax = jnp.transpose(w[:, :, ::-1, ::-1], (1, 0, 2, 3))   # OIHW, spatially flipped
        y = jax.lax.conv_general_dilated(
            x, w_lax, window_strides=(1, 1), padding=((1, 2), (1, 2)),
            lhs_dilation=(2, 2), rhs_dilation=(1, 1),
            dimension_numbers=("NCHW", "OIHW", "NCHW"))
        return y + b[None, :, None, None]

    q = bn(conv1x1(query, p["wq"], p["bq"]), p["bn_q"])
    k = bn(conv1x1(key_inp, p["wk"], p["bk"]), p["bn_k"])
    v = bn(conv1x1(key_inp, p["wv"], p["bv"]), p["bn_v"])
    s = jnp.einsum("bchw,bcgw->bchg", q, k) / jnp.sqrt(jnp.float32(q.shape[-1]))
    a = jax.nn.softmax(s, axis=-1)
    ao = jnp.einsum("bchg,bcgw->bchw", a, v)
    out = bn(convT(ao, p["w_out"], p["b_out"]), p["bn_out"])
    return out + convT(query, p["w_res"], p["b_res"])


# ----------------------------------------------------------------------------
if __name__ == "__main__":
    B, Cq, Ck, Co, H, W = 2, 4, 6, 8, 16, 16
    root = jax.random.PRNGKey(0)
    kq, kk, kp = jax.random.split(root, 3)
    query = jax.random.normal(kq, (B, Cq, H, W), dtype=jnp.float32)
    key_inp = jax.random.normal(kk, (B, Ck, H, W), dtype=jnp.float32)
    params = init_params(kp, Cq, Ck, Co)

    out = cross_attention_forward(query, key_inp, params)
    out = jax.block_until_ready(out)
    assert out.shape == (B, Co, 2 * H, 2 * W), out.shape

    ref = reference_forward(query, key_inp, params)
    np.testing.assert_allclose(np.asarray(out), np.asarray(ref), rtol=2e-2, atol=2e-2)

    print("KERNEL_OK")
</pallas_src>

<mosaic_0001>
module attributes {stable_mosaic.version = 11 : i64} {
  func.func @_matmul_bias_kernel(%arg0: i32, %arg1: memref<256x10xf32, #tpu.memory_space<vmem>>, %arg2: memref<10x24xf32, #tpu.memory_space<vmem>>, %arg3: memref<1x24xf32, #tpu.memory_space<vmem>>, %arg4: memref<256x24xf32, #tpu.memory_space<vmem>>) attributes {dimension_semantics = [#tpu.dimension_semantics<parallel>], iteration_bounds = array<i64: 2>, scalar_prefetch = 0 : i64, scratch_operands = 0 : i64, tpu.core_type = #tpu.core_type<tc>, window_params = [{transform_indices = @transform_0, window_bounds = array<i64: 256, 10>}, {pipeline_mode = #tpu.pipeline_mode<synchronous>, transform_indices = @transform_1, window_bounds = array<i64: 10, 24>}, {pipeline_mode = #tpu.pipeline_mode<synchronous>, transform_indices = @transform_2, window_bounds = array<i64: 1, 24>}, {transform_indices = @transform_3, window_bounds = array<i64: 256, 24>}]} {
    %c0 = arith.constant 0 : index
    %c0_0 = arith.constant 0 : index
    %0 = vector.load %arg1[%c0, %c0_0] : memref<256x10xf32, #tpu.memory_space<vmem>>, vector<256x10xf32>
    %c0_1 = arith.constant 0 : index
    %c0_2 = arith.constant 0 : index
    %1 = vector.load %arg2[%c0_1, %c0_2] : memref<10x24xf32, #tpu.memory_space<vmem>>, vector<10x24xf32>
    %cst = arith.constant dense<0.000000e+00> : vector<256x24xf32>
    %2 = tpu.matmul %0, %1, %cst {dimension_numbers = #tpu.dot_dimension_numbers<[1], [0], [0], [1], [0, 0, 1, 1], [], []>} : vector<256x10xf32>, vector<10x24xf32>, vector<256x24xf32> -> vector<256x24xf32>
    %c0_3 = arith.constant 0 : index
    %c0_4 = arith.constant 0 : index
    %3 = vector.load %arg3[%c0_3, %c0_4] : memref<1x24xf32, #tpu.memory_space<vmem>>, vector<1x24xf32>
    %4 = vector.broadcast %3 : vector<1x24xf32> to vector<256x24xf32>
    %5 = arith.addf %2, %4 : vector<256x24xf32>
    %c0_5 = arith.constant 0 : index
    %c0_6 = arith.constant 0 : index
    %6 = vector.load %arg4[%c0_5, %c0_6] : memref<256x24xf32, #tpu.memory_space<vmem>>, vector<256x24xf32>
    tpu.vector_store %arg4[%c0_5, %c0_6], %5 {strides = array<i32>} : memref<256x24xf32, #tpu.memory_space<vmem>>, vector<256x24xf32>,
    return
  }
  func.func @transform_0(%arg0: i32) -> (i32, i32) {
    %c0_i32 = arith.constant 0 : i32
    %c0_i32_0 = arith.constant 0 : i32
    return %arg0, %c0_i32 : i32, i32
  }
  func.func @transform_1(%arg0: i32) -> (i32, i32) {
    %c0_i32 = arith.constant 0 : i32
    %c0_i32_0 = arith.constant 0 : i32
    %c0_i32_1 = arith.constant 0 : i32
    return %c0_i32, %c0_i32_0 : i32, i32
  }
  func.func @transform_2(%arg0: i32) -> (i32, i32) {
    %c0_i32 = arith.constant 0 : i32
    %c0_i32_0 = arith.constant 0 : i32
    %c0_i32_1 = arith.constant 0 : i32
    return %c0_i32, %c0_i32_0 : i32, i32
  }
  func.func @transform_3(%arg0: i32) -> (i32, i32) {
    %c0_i32 = arith.constant 0 : i32
    %c0_i32_0 = arith.constant 0 : i32
    return %arg0, %c0_i32 : i32, i32
  }
}

</mosaic_0001>

<bundles_post_ra>
// kernel: tpu_custom_call.1
= control target key start
LH: loop header
LB: loop body
LE: loop exit
PB: predicated region body
PF: predicated region fallthrough
CT: control target
= control target key end

     0   :  { %s807_s12 = smov 0   ;;  %s1006_s0 = inlined_call_operand.vmem [shape: f32[512,10], index: 0, kind: input, shape index: {}]   ;;  %s1007_s1 = inlined_call_operand.vmem [shape: f32[10,24], index: 1, kind: input, shape index: {}]   ;;  %s1008_s2 = inlined_call_operand.vmem [shape: f32[1,24], index: 2, kind: input, shape index: {}]   ;;  %s1009_s3 = inlined_call_operand.vmem [shape: f32[512,24], index: 3, kind: output, shape index: {}]  }
   0x1 LB: > { %s630_s13 = sadd.s32 4294967295, %s784_s12   ;;  %p634_p0 = scmp.ge.s32.totalorder %s784_s12, 1  ;;  %s784_s12 = sphi %s807_s12, %s13_s12  }
   0x2   : > { %p138_p1 = scmp.lt.s32.totalorder %s784_s12, 3 }
   0x4   : > { %p139_p2 = pnand %p634_p0, %p138_p1 }
   0x5   : > { %v206_v0 = vld [vmem:[%s1007_s1] sm:$0xff] (!%p139_p2)  ;;  %v207_v1 = vld [vmem:[%s1007_s1 + $0x8] sm:$0x3] (!%p139_p2)  ;;  %vm312_vm0 = vcmask (!%p139_p2), 1041408   ;;  %s635_s18 = sshll.u32 (!%p139_p2), %s630_s13, 5  ;;  %vm786_vm1 = vmmov (!%p139_p2), 1  }
   0x6   : > { %142 = sbr.rel (%p139_p2) target bundleno = 263 (0x107), region = 32  ;;  %v761_v2 = vpack.c.bf16 (!%p139_p2), %v207_v1, %v206_v0  ;;  %vm762_vm2 = vmpackc.low (!%p139_p2), %vm312_vm0, %vm786_vm1  ;;  %p163_p3 = scmp.lt.s32.totalorder (!%p139_p2), %s635_s18, 63  ;;  %vm215_vm3 = vcmask (!%p139_p2), 80896   ;;  %v898_v35 = vld [vmem:[%s1008_s2] ss:$0 sm:$0xff] (!%p139_p2)  ;;  %vm541_vm4 = vcmask (!%p139_p2), 195584  }
   0x8   : > { %763 = vmatprep.subr.msk.bf16.mxu0 (!%p139_p2), %vm762_vm2, %v761_v2  ;;  %767 = vmatprep.subr.msk.bf16.mxu1 (!%p139_p2), %vm762_vm2, %v761_v2 }
   0x9   : > { %766 = vmatpush3.bf16.msk.msra.mxu0 (!%p139_p2), %vm762_vm2, %v761_v2  ;;  %768 = vmatpush3.bf16.msk.msra.mxu1 (!%p139_p2), %vm762_vm2, %v761_v2 }
   0xd   : > { %s1011_s18 = smov (!%p163_p3, %s635_s18), 63 }
   0xe   : > { %s636_s19 = sshll.u32 %s1011_s18, 3 }
   0xf   : > { %s829_s22 = scalar_lea.vmem %s1006_s0, %s636_s19  ;;  %s905_s27 = scalar_lea.vmem %s1009_s3, %s636_s19 }
  0x10   : > { %v174_v3 = vld [vmem:[%s829_s22] sm:$0xff]  ;;  %v175_v5 = vld [vmem:[%s829_s22 + $0x8] sm:$0xff]  ;;  %v176_v7 = vld [vmem:[%s829_s22 + $0x10] sm:$0xff] }
  0x11   : > { %v190_v4 = vld [vmem:[%s829_s22 + $0x80] sm:$0xff]  ;;  %713 = vmatprep.mubr.msk.f32.mxu0 %vm215_vm3, %v174_v3  ;;  %v191_v6 = vld [vmem:[%s829_s22 + $0x88] sm:$0xff]  ;;  %v192_v8 = vld [vmem:[%s829_s22 + $0x90] sm:$0xff] }
  0x12   : > { %737 = vmatprep.mubr.msk.f32.mxu1 %vm215_vm3, %v190_v4  ;;  %714 = vmatmul.mubr.msk.f32.vlgmr.msra.gmra.mrb[0].mxu0 %vm215_vm3, %v175_v5  ;;  %v177_v9 = vld [vmem:[%s829_s22 + $0x18] sm:$0xff]  ;;  %v178_v11 = vld [vmem:[%s829_s22 + $0x20] sm:$0xff]  ;;  %v179_v13 = vld [vmem:[%s829_s22 + $0x28] sm:$0xff] }
  0x13   : > { %738 = vmatmul.mubr.msk.f32.vlgmr.msra.gmra.mrb[0].mxu1 %vm215_vm3, %v191_v6  ;;  %716 = vmatprep.mubr.msk.f32.mxu0 %vm215_vm3, %v176_v7  ;;  %v193_v10 = vld [vmem:[%s829_s22 + $0x98] sm:$0xff]  ;;  %v194_v12 = vld [vmem:[%s829_s22 + $0xa0] sm:$0xff]  ;;  %v195_v14 = vld [vmem:[%s829_s22 + $0xa8] sm:$0xff] }
  0x14   : > { %740 = vmatprep.mubr.msk.f32.mxu1 %vm215_vm3, %v192_v8  ;;  %v180_v15 = vld [vmem:[%s829_s22 + $0x30] sm:$0xff]  ;;  %v181_v17 = vld [vmem:[%s829_s22 + $0x38] sm:$0xff]  ;;  %v182_v19 = vld [vmem:[%s829_s22 + $0x40] sm:$0xff] }
  0x15   : > { %v196_v16 = vld [vmem:[%s829_s22 + $0xb0] sm:$0xff]  ;;  %v197_v18 = vld [vmem:[%s829_s22 + $0xb8] sm:$0xff]  ;;  %v198_v20 = vld [vmem:[%s829_s22 + $0xc0] sm:$0xff] }
  0x16   : > { %717 = vmatmul.mubr.msk.f32.gmra.mrb[2].mxu0 %vm215_vm3, %v177_v9  ;;  %v183_v21 = vld [vmem:[%s829_s22 + $0x48] sm:$0xff]  ;;  %v184_v23 = vld [vmem:[%s829_s22 + $0x50] sm:$0xff]  ;;  %v185_v25 = vld [vmem:[%s829_s22 + $0x58] sm:$0xff] }
  0x17   : > { %741 = vmatmul.mubr.msk.f32.gmra.mrb[2].mxu1 %vm215_vm3, %v193_v10  ;;  %719 = vmatprep.mubr.msk.f32.mxu0 %vm215_vm3, %v178_v11  ;;  %v199_v22 = vld [vmem:[%s829_s22 + $0xc8] sm:$0xff]  ;;  %v200_v24 = vld [vmem:[%s829_s22 + $0xd0] sm:$0xff]  ;;  %v201_v26 = vld [vmem:[%s829_s22 + $0xd8] sm:$0xff] }
  0x18   : > { %743 = vmatprep.mubr.msk.f32.mxu1 %vm215_vm3, %v194_v12  ;;  %v186_v27 = vld [vmem:[%s829_s22 + $0x60] sm:$0xff]  ;;  %v187_v29 = vld [vmem:[%s829_s22 + $0x68] sm:$0xff]  ;;  %v188_v31 = vld [vmem:[%s829_s22 + $0x70] sm:$0xff] }
  0x19   : > { %v202_v28 = vld [vmem:[%s829_s22 + $0xe0] sm:$0xff]  ;;  %v203_v30 = vld [vmem:[%s829_s22 + $0xe8] sm:$0xff]  ;;  %v204_v32 = vld [vmem:[%s829_s22 + $0xf0] sm:$0xff] }
  0x1a   : > { %720 = vmatmul.mubr.msk.f32.gmra.mrb[4].mxu0 %vm215_vm3, %v179_v13  ;;  %v189_v33 = vld [vmem:[%s829_s22 + $0x78] sm:$0xff] }
  0x1b   : > { %744 = vmatmul.mubr.msk.f32.gmra.mrb[4].mxu1 %vm215_vm3, %v195_v14  ;;  %722 = vmatprep.mubr.msk.f32.mxu0 %vm215_vm3, %v180_v15  ;;  %v205_v34 = vld [vmem:[%s829_s22 + $0xf8] sm:$0xff] }
  0x1c   : > { %746 = vmatprep.mubr.msk.f32.mxu1 %vm215_vm3, %v196_v16 }
  0x1e   : > { %723 = vmatmul.mubr.msk.f32.gmra.mrb[6].mxu0 %vm215_vm3, %v181_v17 }
  0x1f   : > { %747 = vmatmul.mubr.msk.f32.gmra.mrb[6].mxu1 %vm215_vm3, %v197_v18  ;;  %725 = vmatprep.mubr.msk.f32.mxu0 %vm215_vm3, %v182_v19 }
  0x20   : > { %749 = vmatprep.mubr.msk.f32.mxu1 %vm215_vm3, %v198_v20 }
  0x22   : > { %726 = vmatmul.mubr.msk.f32.gmra.mrb[8].mxu0 %vm215_vm3, %v183_v21 }
  0x23   : > { %750 = vmatmul.mubr.msk.f32.gmra.mrb[8].mxu1 %vm215_vm3, %v199_v22  ;;  %728 = vmatprep.mubr.msk.f32.mxu0 %vm215_vm3, %v184_v23 }
  0x24   : > { %752 = vmatprep.mubr.msk.f32.mxu1 %vm215_vm3, %v200_v24 }
  0x26   : > { %729 = vmatmul.mubr.msk.f32.gmra.mrb[10].mxu0 %vm215_vm3, %v185_v25 }
  0x27   : > { %753 = vmatmul.mubr.msk.f32.gmra.mrb[10].mxu1 %vm215_vm3, %v201_v26  ;;  %731 = vmatprep.mubr.msk.f32.mxu0 %vm215_vm3, %v186_v27 }
  0x28   : > { %755 = vmatprep.mubr.msk.f32.mxu1 %vm215_vm3, %v202_v28 }
  0x2a   : > { %732 = vmatmul.mubr.msk.f32.gmra.mrb[12].mxu0 %vm215_vm3, %v187_v29 }
  0x2b   : > { %756 = vmatmul.mubr.msk.f32.gmra.mrb[12].mxu1 %vm215_vm3, %v203_v30  ;;  %734 = vmatprep.mubr.msk.f32.mxu0 %vm215_vm3, %v188_v31 }
  0x2c   : > { %758 = vmatprep.mubr.msk.f32.mxu1 %vm215_vm3, %v204_v32 }
  0x2e   : > { %735 = vmatmul.mubr.msk.f32.gmra.mrb[14].mxu0 %vm215_vm3, %v189_v33 }
  0x2f   : > { %759 = vmatmul.mubr.msk.f32.gmra.mrb[14].mxu1 %vm215_vm3, %v205_v34 }
  0xe5   : > { %v715_v36 = vpop.f32.mrb[0].mxu0 }
  0xe6   : > { %v739_v37 = vpop.f32.mrb[0].mxu1  ;;  %v388_v38 = vadd.f32 %v715_v36, %v898_v35  ;;  %v382_v40 = vpop.f32.mrb[1].mxu0 }
  0xe7   : > { %v468_v39 = vadd.f32 %v739_v37, %v898_v35  ;;  %v462_v41 = vpop.f32.mrb[1].mxu1  ;;  %v383_v42 = vadd.f32 %v898_v35, %v382_v40 }
  0xe8   : > { %v463_v43 = vadd.f32 %v898_v35, %v462_v41  ;;  %543 = vst.msk [vmem:[%s905_s27 + $0x8] sm:$0xff] %vm541_vm4, %v388_v38 }
  0xe9   : > { %559 = vst.msk [vmem:[%s905_s27 + $0x88] sm:$0xff] %vm541_vm4, %v468_v39  ;;  %542 = vst.msk [vmem:[%s905_s27] sm:$0xff] %vm541_vm4, %v383_v42  ;;  %v718_v44 = vpop.f32.mrb[2].mxu0 }
  0xea   : > { %558 = vst.msk [vmem:[%s905_s27 + $0x80] sm:$0xff] %vm541_vm4, %v463_v43  ;;  %v742_v45 = vpop.f32.mrb[2].mxu1  ;;  %v398_v46 = vadd.f32 %v718_v44, %v898_v35  ;;  %v392_v48 = vpop.f32.mrb[3].mxu0 }
  0xeb   : > { %v478_v47 = vadd.f32 %v742_v45, %v898_v35  ;;  %v472_v49 = vpop.f32.mrb[3].mxu1  ;;  %v393_v50 = vadd.f32 %v898_v35, %v392_v48 }
  0xec   : > { %v473_v51 = vadd.f32 %v898_v35, %v472_v49  ;;  %545 = vst.msk [vmem:[%s905_s27 + $0x18] sm:$0xff] %vm541_vm4, %v398_v46 }
  0xed   : > { %561 = vst.msk [vmem:[%s905_s27 + $0x98] sm:$0xff] %vm541_vm4, %v478_v47  ;;  %544 = vst.msk [vmem:[%s905_s27 + $0x10] sm:$0xff] %vm541_vm4, %v393_v50  ;;  %v721_v52 = vpop.f32.mrb[4].mxu0 }
  0xee   : > { %560 = vst.msk [vmem:[%s905_s27 + $0x90] sm:$0xff] %vm541_vm4, %v473_v51  ;;  %v745_v53 = vpop.f32.mrb[4].mxu1  ;;  %v408_v54 = vadd.f32 %v721_v52, %v898_v35  ;;  %v402_v56 = vpop.f32.mrb[5].mxu0 }
  0xef   : > { %v488_v55 = vadd.f32 %v745_v53, %v898_v35  ;;  %v482_v57 = vpop.f32.mrb[5].mxu1  ;;  %v403_v58 = vadd.f32 %v898_v35, %v402_v56 }
  0xf0   : > { %v483_v59 = vadd.f32 %v898_v35, %v482_v57  ;;  %547 = vst.msk [vmem:[%s905_s27 + $0x28] sm:$0xff] %vm541_vm4, %v408_v54 }
  0xf1   : > { %563 = vst.msk [vmem:[%s905_s27 + $0xa8] sm:$0xff] %vm541_vm4, %v488_v55  ;;  %546 = vst.msk [vmem:[%s905_s27 + $0x20] sm:$0xff] %vm541_vm4, %v403_v58  ;;  %v724_v60 = vpop.f32.mrb[6].mxu0 }
  0xf2   : > { %562 = vst.msk [vmem:[%s905_s27 + $0xa0] sm:$0xff] %vm541_vm4, %v483_v59  ;;  %v748_v61 = vpop.f32.mrb[6].mxu1  ;;  %v418_v62 = vadd.f32 %v724_v60, %v898_v35  ;;  %v412_v0 = vpop.f32.mrb[7].mxu0 }
  0xf3   : > { %v498_v63 = vadd.f32 %v748_v61, %v898_v35  ;;  %v492_v1 = vpop.f32.mrb[7].mxu1  ;;  %v413_v2 = vadd.f32 %v898_v35, %v412_v0 }
  0xf4   : > { %v493_v3 = vadd.f32 %v898_v35, %v492_v1  ;;  %549 = vst.msk [vmem:[%s905_s27 + $0x38] sm:$0xff] %vm541_vm4, %v418_v62 }
  0xf5   : > { %565 = vst.msk [vmem:[%s905_s27 + $0xb8] sm:$0xff] %vm541_vm4, %v498_v63  ;;  %548 = vst.msk [vmem:[%s905_s27 + $0x30] sm:$0xff] %vm541_vm4, %v413_v2  ;;  %v727_v4 = vpop.f32.mrb[8].mxu0 }
  0xf6   : > { %564 = vst.msk [vmem:[%s905_s27 + $0xb0] sm:$0xff] %vm541_vm4, %v493_v3  ;;  %v751_v5 = vpop.f32.mrb[8].mxu1  ;;  %v428_v6 = vadd.f32 %v727_v4, %v898_v35  ;;  %v422_v8 = vpop.f32.mrb[9].mxu0 }
  0xf7   : > { %v508_v7 = vadd.f32 %v751_v5, %v898_v35  ;;  %v502_v9 = vpop.f32.mrb[9].mxu1  ;;  %v423_v10 = vadd.f32 %v898_v35, %v422_v8 }
  0xf8   : > { %v503_v11 = vadd.f32 %v898_v35, %v502_v9  ;;  %551 = vst.msk [vmem:[%s905_s27 + $0x48] sm:$0xff] %vm541_vm4, %v428_v6 }
  0xf9   : > { %567 = vst.msk [vmem:[%s905_s27 + $0xc8] sm:$0xff] %vm541_vm4, %v508_v7  ;;  %550 = vst.msk [vmem:[%s905_s27 + $0x40] sm:$0xff] %vm541_vm4, %v423_v10  ;;  %v730_v12 = vpop.f32.mrb[10].mxu0 }
  0xfa   : > { %566 = vst.msk [vmem:[%s905_s27 + $0xc0] sm:$0xff] %vm541_vm4, %v503_v11  ;;  %v754_v13 = vpop.f32.mrb[10].mxu1  ;;  %v438_v14 = vadd.f32 %v730_v12, %v898_v35  ;;  %v432_v16 = vpop.f32.mrb[11].mxu0 }
  0xfb   : > { %v518_v15 = vadd.f32 %v754_v13, %v898_v35  ;;  %v512_v17 = vpop.f32.mrb[11].mxu1  ;;  %v433_v18 = vadd.f32 %v898_v35, %v432_v16 }
  0xfc   : > { %v513_v19 = vadd.f32 %v898_v35, %v512_v17  ;;  %553 = vst.msk [vmem:[%s905_s27 + $0x58] sm:$0xff] %vm541_vm4, %v438_v14 }
  0xfd   : > { %569 = vst.msk [vmem:[%s905_s27 + $0xd8] sm:$0xff] %vm541_vm4, %v518_v15  ;;  %552 = vst.msk [vmem:[%s905_s27 + $0x50] sm:$0xff] %vm541_vm4, %v433_v18  ;;  %v733_v20 = vpop.f32.mrb[12].mxu0 }
  0xfe   : > { %568 = vst.msk [vmem:[%s905_s27 + $0xd0] sm:$0xff] %vm541_vm4, %v513_v19  ;;  %v757_v21 = vpop.f32.mrb[12].mxu1  ;;  %v448_v22 = vadd.f32 %v733_v20, %v898_v35  ;;  %v442_v24 = vpop.f32.mrb[13].mxu0 }
  0xff   : > { %v528_v23 = vadd.f32 %v757_v21, %v898_v35  ;;  %v522_v25 = vpop.f32.mrb[13].mxu1  ;;  %v443_v26 = vadd.f32 %v898_v35, %v442_v24 }
 0x100   : > { %v523_v27 = vadd.f32 %v898_v35, %v522_v25  ;;  %555 = vst.msk [vmem:[%s905_s27 + $0x68] sm:$0xff] %vm541_vm4, %v448_v22 }
 0x101   : > { %571 = vst.msk [vmem:[%s905_s27 + $0xe8] sm:$0xff] %vm541_vm4, %v528_v23  ;;  %554 = vst.msk [vmem:[%s905_s27 + $0x60] sm:$0xff] %vm541_vm4, %v443_v26  ;;  %v736_v28 = vpop.f32.mrb[14].mxu0 }
 0x102   : > { %570 = vst.msk [vmem:[%s905_s27 + $0xe0] sm:$0xff] %vm541_vm4, %v523_v27  ;;  %v760_v29 = vpop.f32.mrb[14].mxu1  ;;  %v458_v30 = vadd.f32 %v736_v28, %v898_v35  ;;  %v452_v32 = vpop.f32.mrb[15].mxu0 }
 0x103   : > { %v538_v31 = vadd.f32 %v760_v29, %v898_v35  ;;  %v532_v33 = vpop.f32.mrb[15].mxu1  ;;  %v453_v34 = vadd.f32 %v898_v35, %v452_v32 }
 0x104   : > { %v533_v36 = vadd.f32 %v898_v35, %v532_v33  ;;  %557 = vst.msk [vmem:[%s905_s27 + $0x78] sm:$0xff] %vm541_vm4, %v458_v30 }
 0x105   : > { %573 = vst.msk [vmem:[%s905_s27 + $0xf8] sm:$0xff] %vm541_vm4, %v538_v31  ;;  %556 = vst.msk [vmem:[%s905_s27 + $0x70] sm:$0xff] %vm541_vm4, %v453_v34 }
 0x106   : > { %572 = vst.msk [vmem:[%s905_s27 + $0xf0] sm:$0xff] %vm541_vm4, %v533_v36 }
 0x107 PF: > { %s13_s12 = sadd.s32 1, %s784_s12  }
 0x108   : > { %p10_p4 = scmp.ge.s32.totalorder %s13_s12, 4  }
 0x10a   :  { %12 = sbr.rel (!%p10_p4) target bundleno = 1 (0x1), region = 62 }

</bundles_post_ra>
